<compile_context>
chip_gen: v7x
topology: tpu7x:2x2x1
jax: 0.10.0
libtpu: 0.0.40
codegen_flags: <defaults>
</compile_context>

<pallas_src>
import functools

import jax
import jax.numpy as jnp
from jax.experimental import pallas as pl
from jax.experimental.pallas import tpu as pltpu

_BN_EPS = 1e-5


# --------------------------------------------------------------------------- #
# Generation-aware sizing
# --------------------------------------------------------------------------- #
@functools.lru_cache(maxsize=None)
def _hw_params():
    """VMEM-capacity-aware limits: big tiles on 128 MiB parts (v5e/v6e), tighter
    budget on 64 MiB parts (v7x-class) so 2-deep buffering stays alive."""
    try:
        vmem = int(pltpu.get_tpu_info().vmem_capacity_bytes)
    except Exception:  # conservative fallback if the query is unavailable
        vmem = 64 * 1024 * 1024
    if vmem >= 96 * 1024 * 1024:          # v5e / v6e (128 MiB VMEM)
        return {"vmem_limit": 96 * 2**20, "target_block": 2 * 2**20,
                "max_tile_l": 2048}
    return {"vmem_limit": 40 * 2**20, "target_block": 1 * 2**20,
            "max_tile_l": 1024}


def _cparams(hw):
    # Both grid axes are parallel (per-tile partial stats, no carried
    # accumulator) -> megacore / v7x 2-TC sharding allowed on either axis.
    return pltpu.CompilerParams(
        dimension_semantics=("parallel", "parallel"),
        vmem_limit_bytes=hw["vmem_limit"],
    )


def _choose_tiles(n_batch, k_dim, crows, length, hw):
    """Pick (batch-fold, tile_L) so each streamed block is ~target_block bytes
    (measured HBM-roofline sweet spot) while respecting the (8,128) rule."""
    bytes_per_lane = max(k_dim, crows) * 4
    target = hw["target_block"]
    if length * bytes_per_lane <= target or length <= 256:
        tile_l = length                                   # full dim: always legal
    else:
        tile_l = min((target // bytes_per_lane) // 128 * 128, hw["max_tile_l"])
        tile_l = max(tile_l, 128)                         # keep a 128 multiple
        if tile_l >= length:
            tile_l = length
    bsub = 1
    for d in range(2, min(n_batch, 8) + 1):               # largest divisor of N
        if n_batch % d == 0 and d * tile_l * bytes_per_lane <= 2 * target:
            bsub = d
    return bsub, tile_l


# --------------------------------------------------------------------------- #
# Pallas kernels
# --------------------------------------------------------------------------- #
def _conv_stats_kernel(w_ref, x_ref, s1_ref, m2_ref, *,
                       bsub, tile_l, l_valid, ragged):
    """Pass 1: (Crows, K) @ (K, tile_L) MXU matmul per batch row; emit ONLY the
    per-(row, tile) BN partials: sum and mean-centered second moment.

    w_ref : (Crows, K)            resident weights (constant index_map)
    x_ref : (bsub, K, tile_L)     input block, positions on the lane axis
    s1_ref: (bsub, 1, Crows, 1)   per-row-per-tile sum over positions
    m2_ref: (bsub, 1, Crows, 1)   per-row-per-tile sum of (y - tile_mean)^2
    """
    if ragged:
        lt = pl.program_id(1)
        col = lt * tile_l + jax.lax.broadcasted_iota(jnp.int32, (1, tile_l), 1)
        mask = col < l_valid
        nv = jnp.minimum(l_valid - lt * tile_l, tile_l).astype(jnp.float32)
        inv = 1.0 / nv
    else:
        mask = None
        inv = 1.0 / float(tile_l)
    w = w_ref[...]
    for b in range(bsub):                                  # static unroll, <= 8
        y = jnp.dot(w, x_ref[b], preferred_element_type=jnp.float32)
        if ragged:
            y = jnp.where(mask, y, 0.0)
        s1 = jnp.sum(y, axis=1, keepdims=True)             # (Crows, 1)
        d = y - s1 * inv                                    # shifted -> stable M2
        if ragged:
            d = jnp.where(mask, d, 0.0)
        m2 = jnp.sum(d * d, axis=1, keepdims=True)          # (Crows, 1)
        s1_ref[b, 0] = s1
        m2_ref[b, 0] = m2


def _conv_affine_relu_kernel(w_ref, scale_ref, shift_ref, x_ref, o_ref, *, bsub):
    """Pass 2: recompute the conv matmul (cheap, MXU idle) and apply the folded
    training-mode BN affine + ReLU with lane-dense stores.

    w_ref    : (Crows, K)            resident weights
    scale/shift: (Crows, 1)          folded BN per-channel affine
    x_ref    : (bsub, K, tile_L)
    o_ref    : (bsub, Crows, tile_L) final output block
    """
    w = w_ref[...]
    scale = scale_ref[...]
    shift = shift_ref[...]
    for b in range(bsub):
        y = jnp.dot(w, x_ref[b], preferred_element_type=jnp.float32)
        o_ref[b] = jnp.maximum(y * scale + shift, 0.0).astype(o_ref.dtype)


# --------------------------------------------------------------------------- #
# Pallas drivers
# --------------------------------------------------------------------------- #
def _stats_pass(xk, wk, bsub, tile_l, hw):
    n, k_dim, lk = xk.shape
    crows = wk.shape[0]
    nb = n // bsub
    nlt = pl.cdiv(lk, tile_l)
    ragged = (lk % tile_l) != 0
    kern = functools.partial(_conv_stats_kernel, bsub=bsub, tile_l=tile_l,
                             l_valid=lk, ragged=ragged)
    return pl.pallas_call(
        kern,
        grid=(nb, nlt),
        in_specs=[
            pl.BlockSpec((crows, k_dim), lambda bi, lt: (0, 0)),
            pl.BlockSpec((bsub, k_dim, tile_l), lambda bi, lt: (bi, 0, lt)),
        ],
        out_specs=(
            pl.BlockSpec((bsub, 1, crows, 1), lambda bi, lt: (bi, lt, 0, 0)),
            pl.BlockSpec((bsub, 1, crows, 1), lambda bi, lt: (bi, lt, 0, 0)),
        ),
        out_shape=(
            jax.ShapeDtypeStruct((n, nlt, crows, 1), jnp.float32),
            jax.ShapeDtypeStruct((n, nlt, crows, 1), jnp.float32),
        ),
        compiler_params=_cparams(hw),
        cost_estimate=pl.CostEstimate(
            flops=2 * n * lk * crows * k_dim,
            transcendentals=0,
            bytes_accessed=int(xk.size * xk.dtype.itemsize
                               + wk.size * wk.dtype.itemsize
                               + 2 * n * nlt * crows * 4)),
    )(wk, xk)


def _conv_affine_relu(xk, wk, scale_rows, shift_rows, out_dtype, bsub, tile_l, hw):
    n, k_dim, lk = xk.shape
    crows = wk.shape[0]
    nb = n // bsub
    nlt = pl.cdiv(lk, tile_l)
    kern = functools.partial(_conv_affine_relu_kernel, bsub=bsub)
    return pl.pallas_call(
        kern,
        grid=(nb, nlt),
        in_specs=[
            pl.BlockSpec((crows, k_dim), lambda bi, lt: (0, 0)),
            pl.BlockSpec((crows, 1), lambda bi, lt: (0, 0)),
            pl.BlockSpec((crows, 1), lambda bi, lt: (0, 0)),
            pl.BlockSpec((bsub, k_dim, tile_l), lambda bi, lt: (bi, 0, lt)),
        ],
        out_specs=pl.BlockSpec((bsub, crows, tile_l), lambda bi, lt: (bi, 0, lt)),
        out_shape=jax.ShapeDtypeStruct((n, crows, lk), out_dtype),
        compiler_params=_cparams(hw),
        cost_estimate=pl.CostEstimate(
            flops=2 * n * lk * crows * k_dim + 3 * n * crows * lk,
            transcendentals=0,
            bytes_accessed=int(xk.size * xk.dtype.itemsize
                               + wk.size * wk.dtype.itemsize
                               + n * crows * lk * jnp.dtype(out_dtype).itemsize)),
    )(wk,
      scale_rows[:, None].astype(jnp.float32),
      shift_rows[:, None].astype(jnp.float32),
      xk)


def _bn_scale_shift_from_partials(s1, m2, lk, tile_l, taps, gamma, beta):
    """Chan/parallel combine of per-(row, tile[, tap]) partials into the folded
    training-mode BatchNorm (biased variance) scale/shift per conv output row."""
    n, nlt, rows, _ = s1.shape
    c = rows // taps
    counts_l = jnp.minimum(tile_l, lk - jnp.arange(nlt) * tile_l).astype(jnp.float32)
    counts = jnp.repeat(
        jnp.broadcast_to(counts_l[None, :], (n, nlt)).reshape(-1), taps)
    s1p = s1[..., 0].reshape(n * nlt * taps, c)
    m2p = m2[..., 0].reshape(n * nlt * taps, c)
    total = jnp.float32(taps * n * lk)
    mean = jnp.sum(s1p, axis=0) / total
    mean_p = s1p / counts[:, None]
    m2t = jnp.sum(m2p, axis=0) + jnp.sum(
        counts[:, None] * jnp.square(mean_p - mean[None, :]), axis=0)
    var = jnp.maximum(m2t / total, 0.0)
    scale_c = gamma * jax.lax.rsqrt(var + _BN_EPS)
    shift_c = beta - mean * scale_c
    return jnp.tile(scale_c, taps), jnp.tile(shift_c, taps)


# --------------------------------------------------------------------------- #
# Wrappers
# --------------------------------------------------------------------------- #
@functools.partial(jax.jit, static_argnames=("use_bf16",))
def _downsample(x, w, gamma, beta, *, use_bf16=False):
    """x: (N, Cin, L) -> (N, Cout, L//2). w: (Cout, Cin, 2) (PyTorch Conv1d)."""
    n, cin, length = x.shape
    cout = w.shape[0]
    lout = length // 2
    hw = _hw_params()
    x = x[:, :, : 2 * lout]                       # PyTorch drops a trailing odd sample
    # TODO(synk): fusing this even/odd tap split into the kernels requires a
    # stride-2 slice along the lane (minor) dim, which Mosaic loads/BlockSpecs
    # cannot reliably express; it stays as one fused XLA relayout pass over x.
    xk = jnp.concatenate([x[:, :, 0::2], x[:, :, 1::2]], axis=1)   # (N, 2Cin, Lout)
    wk = jnp.transpose(w, (0, 2, 1)).reshape(cout, 2 * cin)        # wk[co, k*Cin+ci]
    if use_bf16:
        xk = xk.astype(jnp.bfloat16)
        wk = wk.astype(jnp.bfloat16)
    bsub, tile_l = _choose_tiles(n, 2 * cin, cout, lout, hw)
    s1, m2 = _stats_pass(xk, wk, bsub, tile_l, hw)
    scale, shift = _bn_scale_shift_from_partials(s1, m2, lout, tile_l, 1, gamma, beta)
    # Pass 2 recomputes the tiny matmul instead of round-tripping an f32 y.
    return _conv_affine_relu(xk, wk, scale, shift, x.dtype, bsub, tile_l, hw)


@functools.partial(jax.jit, static_argnames=("use_bf16",))
def _upsample(x, w, gamma, beta, *, use_bf16=False):
    """x: (N, Cin, L) -> (N, Cout, 2*L). w: (Cin, Cout, 2) (PyTorch ConvTranspose1d)."""
    n, cin, length = x.shape
    cout = w.shape[1]
    hw = _hw_params()
    wk = jnp.transpose(w, (2, 1, 0)).reshape(2 * cout, cin)        # wk[k*Cout+co, ci]
    xk = x
    if use_bf16:
        xk = xk.astype(jnp.bfloat16)
        wk = wk.astype(jnp.bfloat16)
    bsub, tile_l = _choose_tiles(n, cin, 2 * cout, length, hw)
    s1, m2 = _stats_pass(xk, wk, bsub, tile_l, hw)
    # BN stats are per output channel: the two tap row-groups are just extra
    # partials in the Chan combine.
    scale_rows, shift_rows = _bn_scale_shift_from_partials(
        s1, m2, length, tile_l, 2, gamma, beta)
    z = _conv_affine_relu(xk, wk, scale_rows, shift_rows, x.dtype, bsub, tile_l, hw)
    # z[n, k*Cout+co, l] == out[n, co, 2*l+k].
    # TODO(synk): the stride-2 lane interleave of the tap rows cannot be
    # expressed by an output BlockSpec and lane-strided stores are not reliably
    # lowerable, so it stays as one fused XLA pass over the output.
    return z.reshape(n, 2, cout, length).transpose(0, 2, 3, 1).reshape(
        n, cout, 2 * length)


class ResamplingLayer1dPallas:
    """JAX/Pallas port of ResamplingLayer1d (training-mode BatchNorm). NCL layout."""

    def __init__(self, in_channels: int, out_channels: int, key: jax.Array,
                 use_bf16_matmul: bool = False) -> None:
        self.in_channels = in_channels
        self.out_channels = out_channels
        self.use_bf16_matmul = use_bf16_matmul
        self._mode = "identity"
        if in_channels != out_channels:
            k_w, k_b = jax.random.split(key)
            fan_in = in_channels * 2  # kernel_size = 2
            bound = float(1.0 / (fan_in ** 0.5))
            if out_channels == in_channels * 2:
                self._mode = "down"
                self.w = jax.random.uniform(
                    k_w, (out_channels, in_channels, 2), jnp.float32, -bound, bound)
            elif in_channels % 2 == 0 and out_channels * 2 == in_channels:
                self._mode = "up"
                self.w = jax.random.uniform(
                    k_w, (in_channels, out_channels, 2), jnp.float32, -bound, bound)
            else:
                raise ValueError(
                    f"Invalid number of channels: {in_channels} -> {out_channels}")
            # Conv/ConvTranspose bias kept for parameter parity; a per-channel
            # constant added before training-mode BatchNorm is cancelled exactly
            # by the mean subtraction, so the kernels never add it.
            self.b = jax.random.uniform(k_b, (out_channels,), jnp.float32, -bound, bound)
            # BatchNorm1d affine params (PyTorch defaults: weight=1, bias=0).
            self.gamma = jnp.ones((out_channels,), jnp.float32)
            self.beta = jnp.zeros((out_channels,), jnp.float32)

    def __call__(self, x: jax.Array) -> jax.Array:
        if self._mode == "identity":
            return x
        if self._mode == "down":
            return _downsample(x, self.w, self.gamma, self.beta,
                               use_bf16=self.use_bf16_matmul)
        return _upsample(x, self.w, self.gamma, self.beta,
                         use_bf16=self.use_bf16_matmul)


# --------------------------------------------------------------------------- #
# Pure-JAX references (for correctness checks only)
# --------------------------------------------------------------------------- #
def _ref_bn_relu(y, gamma, beta):
    mean = jnp.mean(y, axis=(0, 2), keepdims=True)
    var = jnp.mean((y - mean) ** 2, axis=(0, 2), keepdims=True)
    yn = (y - mean) / jnp.sqrt(var + _BN_EPS)
    return jnp.maximum(yn * gamma[None, :, None] + beta[None, :, None], 0.0)


def _ref_down(x, w, b, gamma, beta):
    lout = x.shape[2] // 2
    xe = x[:, :, 0:2 * lout:2]
    xo = x[:, :, 1:2 * lout:2]
    y = (jnp.einsum("oi,nil->nol", w[:, :, 0], xe)
         + jnp.einsum("oi,nil->nol", w[:, :, 1], xo)
         + b[None, :, None])
    return _ref_bn_relu(y, gamma, beta)


def _ref_up(x, w, b, gamma, beta):
    n, _, length = x.shape
    cout = w.shape[1]
    y0 = jnp.einsum("io,nil->nol", w[:, :, 0], x) + b[None, :, None]
    y1 = jnp.einsum("io,nil->nol", w[:, :, 1], x) + b[None, :, None]
    y = jnp.stack([y0, y1], axis=-1).reshape(n, cout, 2 * length)
    return _ref_bn_relu(y, gamma, beta)


# --------------------------------------------------------------------------- #
# Demo / smoke test
# --------------------------------------------------------------------------- #
if __name__ == "__main__":
    key = jax.random.PRNGKey(0)
    k_x1, k_x2, k_x3, k_x4, k_p1, k_p2, k_p3, k_p4 = jax.random.split(key, 8)

    N, L = 2, 16

    # Downsample: 4 -> 8 channels, L halves.
    x_down = jax.random.normal(k_x1, (N, 4, L), jnp.float32)
    layer_down = ResamplingLayer1dPallas(4, 8, k_p1)
    y_down = layer_down(x_down)
    assert y_down.shape == (N, 8, L // 2), y_down.shape
    ref_down = _ref_down(x_down, layer_down.w, layer_down.b,
                         layer_down.gamma, layer_down.beta)
    assert bool(jnp.allclose(y_down, ref_down, rtol=1e-4, atol=1e-4)), (
        float(jnp.max(jnp.abs(y_down - ref_down))))

    # Upsample: 4 -> 2 channels, L doubles.
    x_up = jax.random.normal(k_x2, (N, 4, L), jnp.float32)
    layer_up = ResamplingLayer1dPallas(4, 2, k_p2)
    y_up = layer_up(x_up)
    assert y_up.shape == (N, 2, 2 * L), y_up.shape
    ref_up = _ref_up(x_up, layer_up.w, layer_up.b, layer_up.gamma, layer_up.beta)
    assert bool(jnp.allclose(y_up, ref_up, rtol=1e-4, atol=1e-4)), (
        float(jnp.max(jnp.abs(y_up - ref_up))))

    # Identity: 4 -> 4 channels.
    x_id = jax.random.normal(k_x3, (N, 4, L), jnp.float32)
    layer_id = ResamplingLayer1dPallas(4, 4, k_p3)
    y_id = layer_id(x_id)
    assert y_id.shape == x_id.shape
    assert bool(jnp.all(y_id == x_id))

    # Slightly larger downsample exercising batch folding / lane-dense tiles.
    x_big = jax.random.normal(k_x4, (4, 8, 256), jnp.float32)
    layer_big = ResamplingLayer1dPallas(8, 16, k_p4)
    y_big = layer_big(x_big)
    assert y_big.shape == (4, 16, 128), y_big.shape
    ref_big = _ref_down(x_big, layer_big.w, layer_big.b,
                        layer_big.gamma, layer_big.beta)
    assert bool(jnp.allclose(y_big, ref_big, rtol=1e-4, atol=1e-4)), (
        float(jnp.max(jnp.abs(y_big - ref_big))))

    jax.block_until_ready((y_down, y_up, y_id, y_big))
    assert bool(jnp.all(y_down >= 0)) and bool(jnp.all(y_up >= 0))  # ReLU outputs
    print("KERNEL_OK")
</pallas_src>

<mosaic_0001>
module attributes {stable_mosaic.version = 11 : i64} {
  func.func @_conv_stats_kernel(%arg0: i32, %arg1: i32, %arg2: memref<8x8xf32, #tpu.memory_space<vmem>>, %arg3: memref<2x8x8xf32, #tpu.memory_space<vmem>>, %arg4: memref<2x1x8x1xf32, #tpu.memory_space<vmem>>, %arg5: memref<2x1x8x1xf32, #tpu.memory_space<vmem>>) attributes {dimension_semantics = [#tpu.dimension_semantics<parallel>, #tpu.dimension_semantics<parallel>], iteration_bounds = array<i64: 1, 1>, scalar_prefetch = 0 : i64, scratch_operands = 0 : i64, tpu.core_type = #tpu.core_type<tc>, window_params = [{pipeline_mode = #tpu.pipeline_mode<synchronous>, transform_indices = @transform_0, window_bounds = array<i64: 8, 8>}, {transform_indices = @transform_1, window_bounds = array<i64: 2, 8, 8>}, {transform_indices = @transform_2, window_bounds = array<i64: 2, 1, 8, 1>}, {transform_indices = @transform_3, window_bounds = array<i64: 2, 1, 8, 1>}]} {
    %c0 = arith.constant 0 : index
    %c0_0 = arith.constant 0 : index
    %0 = vector.load %arg2[%c0, %c0_0] : memref<8x8xf32, #tpu.memory_space<vmem>>, vector<8x8xf32>
    %c0_1 = arith.constant 0 : index
    %c0_2 = arith.constant 0 : index
    %c0_3 = arith.constant 0 : index
    %1 = vector.load %arg3[%c0_1, %c0_2, %c0_3] : memref<2x8x8xf32, #tpu.memory_space<vmem>>, vector<1x8x8xf32>
    %2 = vector.shape_cast %1 : vector<1x8x8xf32> to vector<8x8xf32>
    %cst = arith.constant dense<0.000000e+00> : vector<8x8xf32>
    %3 = tpu.matmul %0, %2, %cst {dimension_numbers = #tpu.dot_dimension_numbers<[1], [0], [0], [1], [0, 0, 1, 1], [], []>} : vector<8x8xf32>, vector<8x8xf32>, vector<8x8xf32> -> vector<8x8xf32>
    %cst_4 = arith.constant dense<0.000000e+00> : vector<8xf32>
    %4 = vector.multi_reduction <add>, %3, %cst_4 [1] : vector<8x8xf32> to vector<8xf32>
    %5 = vector.shape_cast %4 : vector<8xf32> to vector<8x1xf32>
    %cst_5 = arith.constant 1.250000e-01 : f32
    %6 = vector.broadcast %cst_5 : f32 to vector<8x1xf32>
    %7 = arith.mulf %5, %6 : vector<8x1xf32>
    %8 = vector.broadcast %7 : vector<8x1xf32> to vector<8x8xf32>
    %9 = arith.subf %3, %8 : vector<8x8xf32>
    %10 = arith.mulf %9, %9 : vector<8x8xf32>
    %cst_6 = arith.constant dense<0.000000e+00> : vector<8xf32>
    %11 = vector.multi_reduction <add>, %10, %cst_6 [1] : vector<8x8xf32> to vector<8xf32>
    %12 = vector.shape_cast %11 : vector<8xf32> to vector<8x1xf32>
    %c0_7 = arith.constant 0 : index
    %c0_8 = arith.constant 0 : index
    %c0_9 = arith.constant 0 : index
    %c0_10 = arith.constant 0 : index
    %13 = vector.load %arg4[%c0_7, %c0_8, %c0_9, %c0_10] : memref<2x1x8x1xf32, #tpu.memory_space<vmem>>, vector<1x1x8x1xf32>
    %14 = vector.shape_cast %13 : vector<1x1x8x1xf32> to vector<8x1xf32>
    %15 = vector.shape_cast %5 : vector<8x1xf32> to vector<1x1x8x1xf32>
    tpu.vector_store %arg4[%c0_7, %c0_8, %c0_9, %c0_10], %15 {strides = array<i32>} : memref<2x1x8x1xf32, #tpu.memory_space<vmem>>, vector<1x1x8x1xf32>,
    %c0_11 = arith.constant 0 : index
    %c0_12 = arith.constant 0 : index
    %c0_13 = arith.constant 0 : index
    %c0_14 = arith.constant 0 : index
    %16 = vector.load %arg5[%c0_11, %c0_12, %c0_13, %c0_14] : memref<2x1x8x1xf32, #tpu.memory_space<vmem>>, vector<1x1x8x1xf32>
    %17 = vector.shape_cast %16 : vector<1x1x8x1xf32> to vector<8x1xf32>
    %18 = vector.shape_cast %12 : vector<8x1xf32> to vector<1x1x8x1xf32>
    tpu.vector_store %arg5[%c0_11, %c0_12, %c0_13, %c0_14], %18 {strides = array<i32>} : memref<2x1x8x1xf32, #tpu.memory_space<vmem>>, vector<1x1x8x1xf32>,
    %c1 = arith.constant 1 : index
    %c0_15 = arith.constant 0 : index
    %c0_16 = arith.constant 0 : index
    %19 = vector.load %arg3[%c1, %c0_15, %c0_16] : memref<2x8x8xf32, #tpu.memory_space<vmem>>, vector<1x8x8xf32>
    %20 = vector.shape_cast %19 : vector<1x8x8xf32> to vector<8x8xf32>
    %cst_17 = arith.constant dense<0.000000e+00> : vector<8x8xf32>
    %21 = tpu.matmul %0, %20, %cst_17 {dimension_numbers = #tpu.dot_dimension_numbers<[1], [0], [0], [1], [0, 0, 1, 1], [], []>} : vector<8x8xf32>, vector<8x8xf32>, vector<8x8xf32> -> vector<8x8xf32>
    %cst_18 = arith.constant dense<0.000000e+00> : vector<8xf32>
    %22 = vector.multi_reduction <add>, %21, %cst_18 [1] : vector<8x8xf32> to vector<8xf32>
    %23 = vector.shape_cast %22 : vector<8xf32> to vector<8x1xf32>
    %cst_19 = arith.constant 1.250000e-01 : f32
    %24 = vector.broadcast %cst_19 : f32 to vector<8x1xf32>
    %25 = arith.mulf %23, %24 : vector<8x1xf32>
    %26 = vector.broadcast %25 : vector<8x1xf32> to vector<8x8xf32>
    %27 = arith.subf %21, %26 : vector<8x8xf32>
    %28 = arith.mulf %27, %27 : vector<8x8xf32>
    %cst_20 = arith.constant dense<0.000000e+00> : vector<8xf32>
    %29 = vector.multi_reduction <add>, %28, %cst_20 [1] : vector<8x8xf32> to vector<8xf32>
    %30 = vector.shape_cast %29 : vector<8xf32> to vector<8x1xf32>
    %c1_21 = arith.constant 1 : index
    %c0_22 = arith.constant 0 : index
    %c0_23 = arith.constant 0 : index
    %c0_24 = arith.constant 0 : index
    %31 = vector.load %arg4[%c1_21, %c0_22, %c0_23, %c0_24] : memref<2x1x8x1xf32, #tpu.memory_space<vmem>>, vector<1x1x8x1xf32>
    %32 = vector.shape_cast %31 : vector<1x1x8x1xf32> to vector<8x1xf32>
    %33 = vector.shape_cast %23 : vector<8x1xf32> to vector<1x1x8x1xf32>
    tpu.vector_store %arg4[%c1_21, %c0_22, %c0_23, %c0_24], %33 {strides = array<i32>} : memref<2x1x8x1xf32, #tpu.memory_space<vmem>>, vector<1x1x8x1xf32>,
    %c1_25 = arith.constant 1 : index
    %c0_26 = arith.constant 0 : index
    %c0_27 = arith.constant 0 : index
    %c0_28 = arith.constant 0 : index
    %34 = vector.load %arg5[%c1_25, %c0_26, %c0_27, %c0_28] : memref<2x1x8x1xf32, #tpu.memory_space<vmem>>, vector<1x1x8x1xf32>
    %35 = vector.shape_cast %34 : vector<1x1x8x1xf32> to vector<8x1xf32>
    %36 = vector.shape_cast %30 : vector<8x1xf32> to vector<1x1x8x1xf32>
    tpu.vector_store %arg5[%c1_25, %c0_26, %c0_27, %c0_28], %36 {strides = array<i32>} : memref<2x1x8x1xf32, #tpu.memory_space<vmem>>, vector<1x1x8x1xf32>,
    return
  }
  func.func @transform_0(%arg0: i32, %arg1: i32) -> (i32, i32) {
    %c0_i32 = arith.constant 0 : i32
    %c0_i32_0 = arith.constant 0 : i32
    %c0_i32_1 = arith.constant 0 : i32
    return %c0_i32, %c0_i32_0 : i32, i32
  }
  func.func @transform_1(%arg0: i32, %arg1: i32) -> (i32, i32, i32) {
    %c0_i32 = arith.constant 0 : i32
    %c0_i32_0 = arith.constant 0 : i32
    return %arg0, %c0_i32, %arg1 : i32, i32, i32
  }
  func.func @transform_2(%arg0: i32, %arg1: i32) -> (i32, i32, i32, i32) {
    %c0_i32 = arith.constant 0 : i32
    %c0_i32_0 = arith.constant 0 : i32
    %c0_i32_1 = arith.constant 0 : i32
    return %arg0, %arg1, %c0_i32, %c0_i32_0 : i32, i32, i32, i32
  }
  func.func @transform_3(%arg0: i32, %arg1: i32) -> (i32, i32, i32, i32) {
    %c0_i32 = arith.constant 0 : i32
    %c0_i32_0 = arith.constant 0 : i32
    %c0_i32_1 = arith.constant 0 : i32
    return %arg0, %arg1, %c0_i32, %c0_i32_0 : i32, i32, i32, i32
  }
}

module attributes {stable_mosaic.version = 11 : i64} {
  func.func @_conv_affine_relu_kernel(%arg0: i32, %arg1: i32, %arg2: memref<8x8xf32, #tpu.memory_space<vmem>>, %arg3: memref<8x1xf32, #tpu.memory_space<vmem>>, %arg4: memref<8x1xf32, #tpu.memory_space<vmem>>, %arg5: memref<2x8x8xf32, #tpu.memory_space<vmem>>, %arg6: memref<2x8x8xf32, #tpu.memory_space<vmem>>) attributes {dimension_semantics = [#tpu.dimension_semantics<parallel>, #tpu.dimension_semantics<parallel>], iteration_bounds = array<i64: 1, 1>, scalar_prefetch = 0 : i64, scratch_operands = 0 : i64, tpu.core_type = #tpu.core_type<tc>, window_params = [{pipeline_mode = #tpu.pipeline_mode<synchronous>, transform_indices = @transform_0, window_bounds = array<i64: 8, 8>}, {pipeline_mode = #tpu.pipeline_mode<synchronous>, transform_indices = @transform_1, window_bounds = array<i64: 8, 1>}, {pipeline_mode = #tpu.pipeline_mode<synchronous>, transform_indices = @transform_2, window_bounds = array<i64: 8, 1>}, {transform_indices = @transform_3, window_bounds = array<i64: 2, 8, 8>}, {transform_indices = @transform_4, window_bounds = array<i64: 2, 8, 8>}]} {
    %c0 = arith.constant 0 : index
    %c0_0 = arith.constant 0 : index
    %0 = vector.load %arg2[%c0, %c0_0] : memref<8x8xf32, #tpu.memory_space<vmem>>, vector<8x8xf32>
    %c0_1 = arith.constant 0 : index
    %c0_2 = arith.constant 0 : index
    %1 = vector.load %arg3[%c0_1, %c0_2] : memref<8x1xf32, #tpu.memory_space<vmem>>, vector<8x1xf32>
    %c0_3 = arith.constant 0 : index
    %c0_4 = arith.constant 0 : index
    %2 = vector.load %arg4[%c0_3, %c0_4] : memref<8x1xf32, #tpu.memory_space<vmem>>, vector<8x1xf32>
    %c0_5 = arith.constant 0 : index
    %c0_6 = arith.constant 0 : index
    %c0_7 = arith.constant 0 : index
    %3 = vector.load %arg5[%c0_5, %c0_6, %c0_7] : memref<2x8x8xf32, #tpu.memory_space<vmem>>, vector<1x8x8xf32>
    %4 = vector.shape_cast %3 : vector<1x8x8xf32> to vector<8x8xf32>
    %cst = arith.constant dense<0.000000e+00> : vector<8x8xf32>
    %5 = tpu.matmul %0, %4, %cst {dimension_numbers = #tpu.dot_dimension_numbers<[1], [0], [0], [1], [0, 0, 1, 1], [], []>} : vector<8x8xf32>, vector<8x8xf32>, vector<8x8xf32> -> vector<8x8xf32>
    %6 = vector.broadcast %1 : vector<8x1xf32> to vector<8x8xf32>
    %7 = arith.mulf %5, %6 : vector<8x8xf32>
    %8 = vector.broadcast %2 : vector<8x1xf32> to vector<8x8xf32>
    %9 = arith.addf %7, %8 : vector<8x8xf32>
    %cst_8 = arith.constant 0.000000e+00 : f32
    %10 = vector.broadcast %cst_8 : f32 to vector<8x8xf32>
    %11 = arith.maximumf %9, %10 : vector<8x8xf32>
    %c0_9 = arith.constant 0 : index
    %c0_10 = arith.constant 0 : index
    %c0_11 = arith.constant 0 : index
    %12 = vector.load %arg6[%c0_9, %c0_10, %c0_11] : memref<2x8x8xf32, #tpu.memory_space<vmem>>, vector<1x8x8xf32>
    %13 = vector.shape_cast %12 : vector<1x8x8xf32> to vector<8x8xf32>
    %14 = vector.shape_cast %11 : vector<8x8xf32> to vector<1x8x8xf32>
    tpu.vector_store %arg6[%c0_9, %c0_10, %c0_11], %14 {strides = array<i32>} : memref<2x8x8xf32, #tpu.memory_space<vmem>>, vector<1x8x8xf32>,
    %c1 = arith.constant 1 : index
    %c0_12 = arith.constant 0 : index
    %c0_13 = arith.constant 0 : index
    %15 = vector.load %arg5[%c1, %c0_12, %c0_13] : memref<2x8x8xf32, #tpu.memory_space<vmem>>, vector<1x8x8xf32>
    %16 = vector.shape_cast %15 : vector<1x8x8xf32> to vector<8x8xf32>
    %cst_14 = arith.constant dense<0.000000e+00> : vector<8x8xf32>
    %17 = tpu.matmul %0, %16, %cst_14 {dimension_numbers = #tpu.dot_dimension_numbers<[1], [0], [0], [1], [0, 0, 1, 1], [], []>} : vector<8x8xf32>, vector<8x8xf32>, vector<8x8xf32> -> vector<8x8xf32>
    %18 = vector.broadcast %1 : vector<8x1xf32> to vector<8x8xf32>
    %19 = arith.mulf %17, %18 : vector<8x8xf32>
    %20 = vector.broadcast %2 : vector<8x1xf32> to vector<8x8xf32>
    %21 = arith.addf %19, %20 : vector<8x8xf32>
    %cst_15 = arith.constant 0.000000e+00 : f32
    %22 = vector.broadcast %cst_15 : f32 to vector<8x8xf32>
    %23 = arith.maximumf %21, %22 : vector<8x8xf32>
    %c1_16 = arith.constant 1 : index
    %c0_17 = arith.constant 0 : index
    %c0_18 = arith.constant 0 : index
    %24 = vector.load %arg6[%c1_16, %c0_17, %c0_18] : memref<2x8x8xf32, #tpu.memory_space<vmem>>, vector<1x8x8xf32>
    %25 = vector.shape_cast %24 : vector<1x8x8xf32> to vector<8x8xf32>
    %26 = vector.shape_cast %23 : vector<8x8xf32> to vector<1x8x8xf32>
    tpu.vector_store %arg6[%c1_16, %c0_17, %c0_18], %26 {strides = array<i32>} : memref<2x8x8xf32, #tpu.memory_space<vmem>>, vector<1x8x8xf32>,
    return
  }
  func.func @transform_0(%arg0: i32, %arg1: i32) -> (i32, i32) {
    %c0_i32 = arith.constant 0 : i32
    %c0_i32_0 = arith.constant 0 : i32
    %c0_i32_1 = arith.constant 0 : i32
    return %c0_i32, %c0_i32_0 : i32, i32
  }
  func.func @transform_1(%arg0: i32, %arg1: i32) -> (i32, i32) {
    %c0_i32 = arith.constant 0 : i32
    %c0_i32_0 = arith.constant 0 : i32
    %c0_i32_1 = arith.constant 0 : i32
    return %c0_i32, %c0_i32_0 : i32, i32
  }
  func.func @transform_2(%arg0: i32, %arg1: i32) -> (i32, i32) {
    %c0_i32 = arith.constant 0 : i32
    %c0_i32_0 = arith.constant 0 : i32
    %c0_i32_1 = arith.constant 0 : i32
    return %c0_i32, %c0_i32_0 : i32, i32
  }
  func.func @transform_3(%arg0: i32, %arg1: i32) -> (i32, i32, i32) {
    %c0_i32 = arith.constant 0 : i32
    %c0_i32_0 = arith.constant 0 : i32
    return %arg0, %c0_i32, %arg1 : i32, i32, i32
  }
  func.func @transform_4(%arg0: i32, %arg1: i32) -> (i32, i32, i32) {
    %c0_i32 = arith.constant 0 : i32
    %c0_i32_0 = arith.constant 0 : i32
    return %arg0, %c0_i32, %arg1 : i32, i32, i32
  }
}

</mosaic_0001>

<bundles_post_ra>
// kernel: _downsample.3
= control target key start
LH: loop header
LB: loop body
LE: loop exit
PB: predicated region body
PF: predicated region fallthrough
CT: control target
= control target key end

     0   :  { %v251_v2 = vmov 0.0   ;;  %vm22_vm0 = vcmask 64512   ;;  %s313_s0 = inlined_call_operand.vmem [shape: f32[8,8], index: 0, kind: input, shape index: {}]   ;;  %s314_s1 = inlined_call_operand.vmem [shape: f32[8,1], index: 1, kind: input, shape index: {}]   ;;  %s315_s2 = inlined_call_operand.vmem [shape: f32[8,1], index: 2, kind: input, shape index: {}]   ;;  %s316_s3 = inlined_call_operand.vmem [shape: f32[2,8,8], index: 3, kind: input, shape index: {}]   ;;  %s317_s4 = inlined_call_operand.hbm [shape: f32[2,8,8], index: 4, kind: output, shape index: {}]  }
   0x1   :  { %v21_v0 = vld [vmem:[%s316_s3] sm:$0xff]  ;;  %v204_v1 = vld [vmem:[%s316_s3 + $0x8] sm:$0xff]  ;;  %210 = vmatprep.subr.mxu0 %v251_v2  ;;  %215 = vmatprep.subr.mxu1 %v251_v2 }
   0x2   :  { %v18_v3 = vld [vmem:[%s313_s0] sm:$0xff] }
   0x3   :  { %9 = vsyncpa [#allocation3], 0  ;;  %211 = vmatpush3.msra.mxu0 %v21_v0  ;;  %vm252_vm1 = vmmov 0   ;;  %216 = vmatpush3.msra.mxu1 %v204_v1  ;;  %v19_v4 = vld [vmem:[%s314_s1] sm:$0xff]  ;;  %v253_v5 = vmov 0   ;;  %s254_s1 = smov [#allocation2]  }
   0x4   :  { %212 = vmatprep.mubr.msk.f32.mxu0 %vm252_vm1, %v251_v2  ;;  %217 = vmatprep.mubr.msk.f32.mxu1 %vm252_vm1, %v251_v2  ;;  %v20_v6 = vld [vmem:[%s315_s2] sm:$0xff]  ;;  %s192_s23 = sshll.u32 %s254_s1, 4  ;;  %s193_s23 = int_to_ptr.vmem [resolvable:$true] %s192_s23 }
   0x5   :  { %213 = vmatmul.mubr.msk.f32.vlgmr.msra.gmra.mrb[0].mxu0 %vm22_vm0, %v18_v3  ;;  %218 = vmatmul.mubr.msk.f32.vlgmr.msra.gmra.mrb[0].mxu1 %vm22_vm0, %v18_v3  ;;  %s227_s2 = scalar_lea.vmem %s193_s23, 256  ;;  %p232_p1 = scmp.lt.s32.totalorder %s193_s23, %s193_s23 }
   0x6   :  { %226 = vset.pattern.permute.xlu0 %v253_v5  ;;  %p228_p0 = scmp.ne.s32.totalorder %s193_s23, %s227_s2  ;;  %p233_p2 = scmp.lt.s32.totalorder %s227_s2, %s227_s2 }
   0x7   :  { %98 = vperm.xlu0 %226, %v19_v4  }
   0x8   :  { %p234_p3 = por %p233_p2, %p232_p1 }
   0xa   :  { %p235_p4 = pnand %p234_p3, %p228_p0 }
   0xb   :  { %104 = vperm.xlu0 %226, %v20_v6  }
  0x86   :  { %v99_v7 = vpop.permute.xlu0 %98 }
  0x8a   :  { %v105_v14 = vpop.permute.xlu0 %104 }
  0xd8   :  { %v92_v8 = vpop.f32.mrb[0].mxu0  ;;  %v178_v9 = vpop.f32.mrb[0].mxu1 }
  0xd9   :  { %v101_v10 = vmul.f32 %v99_v7, %v92_v8  ;;  %v182_v11 = vmul.f32 %v178_v9, %v99_v7  ;;  %v214_v12 = vpop.f32.mrb[1].mxu0  ;;  %v219_v13 = vpop.f32.mrb[1].mxu1 }
  0xdb   :  { %v107_v15 = vadd.f32 %v105_v14, %v101_v10  ;;  %v183_v16 = vadd.f32 %v182_v11, %v105_v14 }
  0xdd   :  { %v108_v17 = vmax.f32 %v107_v15, 0.0  ;;  %v184_v18 = vmax.f32 %v183_v16, 0.0 }
  0xdf   :  { %109 = vst.msk [vmem:[#allocation2] sm:$0xff] %vm22_vm0, %v108_v17  ;;  %186 = vst.msk [vmem:[#allocation2 + $0x8] sm:$0xff] %vm22_vm0, %v184_v18 }
  0xe0   :  { %238 = shalt.err (!%p235_p4)
}
  0xe1   :  { %s239_s26 = scalar_lea.hbm %s317_s4, 256 }
  0xe2   :  { %p240_p5 = scmp.ne.s32.totalorder %s317_s4, %s239_s26  ;;  %p243_p6 = scmp.lt.u32.totalorder %s239_s26, %s317_s4 }
  0xe4   :  { %p245_p7 = pnand %p243_p6, %p240_p5 }
  0xe6   :  { %248 = shalt.err (!%p245_p7)
}
  0xe7   :  { %s255_s5 = smov 128   ;;  %s256_s6 = smov 8  }
  0xe8   :  { %198 = dma.vmem_to_hbm [thread:$0]  %s193_s23, 256, %s317_s4, [#allocation3], %s255_s5, %s255_s5, %s256_s6  }
  0xe9   :  { %249 = dma.done.wait [#allocation3], 256  }
  0xea   :  { %250 = vsyncadd [#allocation3], 4294967040 }
  0xeb   :  { %202 = vsyncpa [#allocation3], 1 }

// kernel: _downsample.2
= control target key start
LH: loop header
LB: loop body
LE: loop exit
PB: predicated region body
PF: predicated region fallthrough
CT: control target
= control target key end

     0   :  { %vm15_vm0 = vcmask 64512   ;;  %v215_v0 = vmov 0.0   ;;  %vm216_vm1 = vmmov 0   ;;  %vm98_vm2 = vcmask 7168   ;;  %s268_s1 = inlined_call_operand.vmem [shape: f32[2,8,8], index: 1, kind: input, shape index: {}]   ;;  %s269_s0 = inlined_call_operand.vmem [shape: f32[8,8], index: 0, kind: input, shape index: {}]   ;;  %s270_s2 = inlined_call_operand.vmem [shape: f32[2,1,8,1], index: 2, kind: output, shape index: {0}]   ;;  %s271_s3 = inlined_call_operand.vmem [shape: f32[2,1,8,1], index: 3, kind: output, shape index: {1}]  }
   0x1   :  { %203 = vmatprep.subr.mxu0 %v215_v0  ;;  %v14_v1 = vld [vmem:[%s268_s1] sm:$0xff]  ;;  %205 = vmatprep.mubr.msk.f32.mxu0 %vm216_vm1, %v215_v0  ;;  %v195_v3 = vld [vmem:[%s268_s1 + $0x8] sm:$0xff] }
   0x2   :  { %v13_v2 = vld [vmem:[%s269_s0] sm:$0xff]  ;;  %204 = vmatpush3.msra.mxu0 %v14_v1  ;;  %208 = vmatprep.subr.mxu1 %v215_v0 }
   0x3   :  { %206 = vmatmul.mubr.msk.f32.vlgmr.msra.gmra.mrb[0].mxu0 %vm15_vm0, %v13_v2  ;;  %209 = vmatpush3.msra.mxu1 %v195_v3 }
   0x4   :  { %210 = vmatprep.mubr.msk.f32.mxu1 %vm216_vm1, %v215_v0 }
   0x5   :  { %211 = vmatmul.mubr.msk.f32.vlgmr.msra.gmra.mrb[0].mxu1 %vm15_vm0, %v13_v2 }
  0xd6   :  { %v85_v4 = vpop.f32.mrb[0].mxu0 }
  0xd7   :  { %v207_v5 = vpop.f32.mrb[1].mxu0  ;;  %v89_v6 = vsel %vm15_vm0, %v85_v4, 0.0 }
  0xd8   :  { %90 = vadd.xlane.f32.xlu0 %v89_v6  ;;  %v169_v7 = vpop.f32.mrb[0].mxu1 }
  0xd9   :  { %v212_v8 = vpop.f32.mrb[1].mxu1  ;;  %v173_v9 = vsel %vm15_vm0, %v169_v7, 0.0 }
  0xdc   :  { %174 = vadd.xlane.f32.xlu0 %v173_v9 }
 0x165   :  { %v91_v10 = vpop.xlane.xlu0 %90 }
 0x166   :  { %v92_v11 = vmul.f32 0.125, %v91_v10  ;;  %99 = vst.msk [vmem:[%s270_s2] sm:$0xff] %vm98_vm2, %v91_v10 }
 0x168   :  { %v93_v12 = vsub.f32 %v85_v4, %v92_v11 }
 0x169   :  { %v175_v13 = vpop.xlane.xlu0 %174 }
 0x16a   :  { %v176_v14 = vmul.f32 0.125, %v175_v13  ;;  %197 = vst.msk [vmem:[%s270_s2 + $0x8] sm:$0xff] %vm98_vm2, %v175_v13  ;;  %v94_v15 = vmul.f32 %v93_v12, %v93_v12 }
 0x16c   :  { %v177_v16 = vsub.f32 %v169_v7, %v176_v14  ;;  %v95_v17 = vsel %vm15_vm0, %v94_v15, 0.0 }
 0x16d   :  { %96 = vadd.xlane.f32.xlu1 %v95_v17 }
 0x16e   :  { %v178_v18 = vmul.f32 %v177_v16, %v177_v16 }
 0x170   :  { %v179_v19 = vsel %vm15_vm0, %v178_v18, 0.0 }
 0x171   :  { %180 = vadd.xlane.f32.xlu1 %v179_v19 }
 0x1fa   :  { %v97_v20 = vpop.xlane.xlu1 %96 }
 0x1fb   :  { %100 = vst.msk [vmem:[%s271_s3] sm:$0xff] %vm98_vm2, %v97_v20 }
 0x1fe   :  { %v181_v21 = vpop.xlane.xlu1 %180 }
 0x1ff   :  { %198 = vst.msk [vmem:[%s271_s3 + $0x8] sm:$0xff] %vm98_vm2, %v181_v21 }

</bundles_post_ra>
